<compile_context>
chip_gen: v6e
topology: v6e:2x2x1
jax: 0.10.0
libtpu: 0.0.40
codegen_flags: <defaults>
</compile_context>

<pallas_src>
import functools

import jax
import jax.numpy as jnp
from jax import lax
from jax.experimental import pallas as pl
from jax.experimental.pallas import tpu as pltpu

_LANES = 128


def _focal2d_kernel(x_ref, t_ref, loss_ref, cnt_ref, *, num_classes,
                    tile_rows, hw_valid, ignore_index):
    # x_ref:    (C, T128, 128) logits tile (any float dtype, cast to f32 here)
    # t_ref:    (T128, 128)    int32 targets tile (lane-dense)
    # loss_ref: (1, 128)       f32 per-lane partial focal-loss sums
    # cnt_ref:  (1, 128)       f32 per-lane partial non-ignored pixel counts
    x = x_ref[...].astype(jnp.float32)            # (C, T128, 128)
    t = t_ref[...]                                # (T128, 128)

    # log-sum-exp over the class axis (leading dim -> elementwise VPU reduce,
    # exps/log go to the EUP slot)
    m = jnp.max(x, axis=0)                        # (T128, 128)
    lse = m + jnp.log(jnp.sum(jnp.exp(x - m[None]), axis=0))

    # logit of the target class via an unrolled one-hot select
    # (num_classes is static; the PyTorch module hard-codes 2 classes)
    sel = jnp.zeros_like(lse)
    for c in range(num_classes):
        sel = sel + jnp.where(t == c, x[c], 0.0)

    log_pt = sel - lse                            # log softmax at target
    pt = jnp.exp(log_pt)                          # softmax prob at target
    loss = (1.0 - pt) * (1.0 - pt) * (-log_pt)    # focal modulation, gamma=2

    # drop ignored targets and (when the pixel axis was padded / the last
    # chunk over-reads) out-of-bounds pixels
    keep = t != ignore_index
    if hw_valid is not None:
        chunk = pl.program_id(1)
        r = lax.broadcasted_iota(jnp.int32, loss.shape, 0)
        l = lax.broadcasted_iota(jnp.int32, loss.shape, 1)
        pix = (chunk * tile_rows + r) * _LANES + l
        keep = jnp.logical_and(keep, pix < hw_valid)
    loss = jnp.where(keep, loss, 0.0)

    loss_ref[...] = jnp.sum(loss, axis=0, keepdims=True)                  # (1,128)
    cnt_ref[...] = jnp.sum(keep.astype(jnp.float32), axis=0, keepdims=True)


def focal_loss_2d(inputs, targets, *, tile_pixels=8192, ignore_index=-100):
    """inputs: (N, C, H, W) float (f32 or bf16); targets: (N, H, W) int.

    Returns the scalar focal loss (gamma=2, mean over non-ignored pixels),
    matching FocalLoss2d(weight=None, size_average=True).
    """
    # TODO(synk): optional per-class NLLLoss `weight` is not implemented
    # (the module's default is weight=None).
    N, C, H, W = inputs.shape
    HW = H * W

    # --- free reshapes into a lane-dense pixel layout (no NCHW->NHWC transpose)
    hw_pad = pl.cdiv(HW, _LANES) * _LANES
    x = inputs.reshape(N, C, HW)
    t = targets.reshape(N, HW).astype(jnp.int32)
    if hw_pad != HW:
        # Only hit when H*W is not a multiple of 128; costs one copy of the logits.
        x = jnp.pad(x, ((0, 0), (0, 0), (0, hw_pad - HW)))
        t = jnp.pad(t, ((0, 0), (0, hw_pad - HW)), constant_values=ignore_index)
    hw128 = hw_pad // _LANES
    x = x.reshape(N, C, hw128, _LANES)
    t = t.reshape(N, hw128, _LANES)

    # --- tile sizing: big tiles amortize the ~0.35us per-grid-step overhead,
    # but keep double-buffered logits+targets comfortably inside scoped VMEM
    # (binds only for large class counts; v7x has 64 MiB physical VMEM).
    bytes_per_pixel = C * inputs.dtype.itemsize + 4
    vmem_cap_pixels = max(
        _LANES, ((12 * 1024 * 1024) // bytes_per_pixel) // _LANES * _LANES)
    tile_pixels = min(tile_pixels, vmem_cap_pixels)

    t128 = max(1, tile_pixels // _LANES)
    if t128 >= hw128:
        t128 = hw128                      # whole pixel axis in one tile
    else:
        t128 = max(8, (t128 // 8) * 8)    # keep sublane-direction tiling aligned
        if t128 >= hw128:
            t128 = hw128
    n_chunks = pl.cdiv(hw128, t128)

    need_mask = (hw_pad != HW) or (hw128 % t128 != 0)
    hw_valid = HW if need_mask else None

    kernel = functools.partial(
        _focal2d_kernel, num_classes=C, tile_rows=t128,
        hw_valid=hw_valid, ignore_index=ignore_index)

    part_spec = pl.BlockSpec((None, None, 1, _LANES), lambda n, i: (n, i, 0, 0))

    loss_part, cnt_part = pl.pallas_call(
        kernel,
        out_shape=(
            jax.ShapeDtypeStruct((N, n_chunks, 1, _LANES), jnp.float32),
            jax.ShapeDtypeStruct((N, n_chunks, 1, _LANES), jnp.float32),
        ),
        grid_spec=pltpu.PrefetchScalarGridSpec(
            num_scalar_prefetch=0,
            grid=(N, n_chunks),
            in_specs=[
                pl.BlockSpec((None, C, t128, _LANES), lambda n, i: (n, 0, i, 0)),
                pl.BlockSpec((None, t128, _LANES), lambda n, i: (n, i, 0)),
            ],
            out_specs=[part_spec, part_spec],
        ),
        compiler_params=pltpu.CompilerParams(
            # every grid point writes disjoint output blocks -> fully parallel;
            # lets the two TensorCores on v7x split the pixel chunks.
            dimension_semantics=("parallel", "parallel"),
        ),
    )(x, t)

    # tiny final reduction over (N, n_chunks, 1, 128) partials; the pixel
    # count comes out of the kernel so targets are never re-read from HBM.
    return jnp.sum(loss_part) / jnp.sum(cnt_part)


def _reference_focal_loss(inputs, targets, ignore_index=-100):
    # pure-JAX reference of the PyTorch forward
    x = inputs.astype(jnp.float32)
    logp = jax.nn.log_softmax(x, axis=1)                                  # (N,C,H,W)
    lp_t = jnp.take_along_axis(logp, targets[:, None, :, :].astype(jnp.int32),
                               axis=1)[:, 0]                              # (N,H,W)
    p_t = jnp.exp(lp_t)
    per_pix = (1.0 - p_t) ** 2 * (-lp_t)
    keep = targets != ignore_index
    return jnp.sum(jnp.where(keep, per_pix, 0.0)) / jnp.sum(keep.astype(jnp.float32))


if __name__ == "__main__":
    key = jax.random.PRNGKey(0)
    k1, k2, k3, k4 = jax.random.split(key, 4)

    # The PyTorch module hard-codes 2 classes via `.repeat(2, 1, 1, 1)`.
    N, C, H, W = 2, 2, 16, 16
    inputs = jax.random.normal(k1, (N, C, H, W), dtype=jnp.float32)
    targets = jax.random.randint(k2, (N, H, W), 0, C, dtype=jnp.int32)

    loss = jax.block_until_ready(focal_loss_2d(inputs, targets))
    ref = jax.block_until_ready(_reference_focal_loss(inputs, targets))
    assert jnp.allclose(loss, ref, atol=1e-5, rtol=1e-5), (loss, ref)

    # ragged spatial size exercises the 128-lane padding + in-kernel tail mask
    inputs2 = jax.random.normal(k3, (N, C, 10, 10), dtype=jnp.float32)
    targets2 = jax.random.randint(k4, (N, 10, 10), 0, C, dtype=jnp.int32)
    loss2 = jax.block_until_ready(focal_loss_2d(inputs2, targets2))
    ref2 = jax.block_until_ready(_reference_focal_loss(inputs2, targets2))
    assert jnp.allclose(loss2, ref2, atol=1e-5, rtol=1e-5), (loss2, ref2)

    print("KERNEL_OK")
</pallas_src>

<mosaic_0001>
module attributes {stable_mosaic.version = 11 : i64} {
  func.func @_focal2d_kernel(%arg0: i32, %arg1: i32, %arg2: memref<1x2x2x128xf32, #tpu.memory_space<vmem>>, %arg3: memref<1x2x128xi32, #tpu.memory_space<vmem>>, %arg4: memref<1x1x1x128xf32, #tpu.memory_space<vmem>>, %arg5: memref<1x1x1x128xf32, #tpu.memory_space<vmem>>) attributes {dimension_semantics = [#tpu.dimension_semantics<parallel>, #tpu.dimension_semantics<parallel>], iteration_bounds = array<i64: 2, 1>, scalar_prefetch = 0 : i64, scratch_operands = 0 : i64, tpu.core_type = #tpu.core_type<tc>, window_params = [{transform_indices = @transform_0, window_bounds = array<i64: 1, 2, 2, 128>}, {transform_indices = @transform_1, window_bounds = array<i64: 1, 2, 128>}, {transform_indices = @transform_2, window_bounds = array<i64: 1, 1, 1, 128>}, {transform_indices = @transform_3, window_bounds = array<i64: 1, 1, 1, 128>}]} {
    %c0 = arith.constant 0 : index
    %c0_0 = arith.constant 0 : index
    %c0_1 = arith.constant 0 : index
    %c0_2 = arith.constant 0 : index
    %0 = vector.load %arg2[%c0, %c0_0, %c0_1, %c0_2] : memref<1x2x2x128xf32, #tpu.memory_space<vmem>>, vector<1x2x2x128xf32>
    %1 = vector.shape_cast %0 : vector<1x2x2x128xf32> to vector<2x2x128xf32>
    %c0_3 = arith.constant 0 : index
    %c0_4 = arith.constant 0 : index
    %c0_5 = arith.constant 0 : index
    %2 = vector.load %arg3[%c0_3, %c0_4, %c0_5] : memref<1x2x128xi32, #tpu.memory_space<vmem>>, vector<1x2x128xi32>
    %3 = vector.shape_cast %2 : vector<1x2x128xi32> to vector<2x128xi32>
    %cst = arith.constant dense<0xFF800000> : vector<2x128xf32>
    %4 = vector.multi_reduction <maximumf>, %1, %cst [0] : vector<2x2x128xf32> to vector<2x128xf32>
    %5 = vector.shape_cast %4 : vector<2x128xf32> to vector<1x2x128xf32>
    %6 = vector.broadcast %5 : vector<1x2x128xf32> to vector<2x2x128xf32>
    %7 = arith.subf %1, %6 : vector<2x2x128xf32>
    %8 = math.exp %7 : vector<2x2x128xf32>
    %cst_6 = arith.constant dense<0.000000e+00> : vector<2x128xf32>
    %9 = vector.multi_reduction <add>, %8, %cst_6 [0] : vector<2x2x128xf32> to vector<2x128xf32>
    %10 = math.log %9 : vector<2x128xf32>
    %11 = arith.addf %4, %10 : vector<2x128xf32>
    %cst_7 = arith.constant 0.000000e+00 : f32
    %12 = vector.broadcast %cst_7 : f32 to vector<2x128xf32>
    %c0_i32 = arith.constant 0 : i32
    %13 = vector.broadcast %c0_i32 : i32 to vector<2x128xi32>
    %14 = arith.cmpi eq, %3, %13 : vector<2x128xi32>
    %15 = vector.extract_strided_slice %1 {offsets = [0, 0, 0], sizes = [1, 2, 128], strides = [1, 1, 1]} : vector<2x2x128xf32> to vector<1x2x128xf32>
    %16 = vector.shape_cast %15 : vector<1x2x128xf32> to vector<2x128xf32>
    %cst_8 = arith.constant 0.000000e+00 : f32
    %17 = vector.broadcast %cst_8 : f32 to vector<2x128xf32>
    %18 = arith.select %14, %16, %17 : vector<2x128xi1>, vector<2x128xf32>
    %19 = arith.addf %12, %18 : vector<2x128xf32>
    %c1_i32 = arith.constant 1 : i32
    %20 = vector.broadcast %c1_i32 : i32 to vector<2x128xi32>
    %21 = arith.cmpi eq, %3, %20 : vector<2x128xi32>
    %22 = vector.extract_strided_slice %1 {offsets = [1, 0, 0], sizes = [1, 2, 128], strides = [1, 1, 1]} : vector<2x2x128xf32> to vector<1x2x128xf32>
    %23 = vector.shape_cast %22 : vector<1x2x128xf32> to vector<2x128xf32>
    %cst_9 = arith.constant 0.000000e+00 : f32
    %24 = vector.broadcast %cst_9 : f32 to vector<2x128xf32>
    %25 = arith.select %21, %23, %24 : vector<2x128xi1>, vector<2x128xf32>
    %26 = arith.addf %19, %25 : vector<2x128xf32>
    %27 = arith.subf %26, %11 : vector<2x128xf32>
    %28 = math.exp %27 : vector<2x128xf32>
    %cst_10 = arith.constant 1.000000e+00 : f32
    %29 = vector.broadcast %cst_10 : f32 to vector<2x128xf32>
    %30 = arith.subf %29, %28 : vector<2x128xf32>
    %cst_11 = arith.constant 1.000000e+00 : f32
    %31 = vector.broadcast %cst_11 : f32 to vector<2x128xf32>
    %32 = arith.subf %31, %28 : vector<2x128xf32>
    %33 = arith.mulf %30, %32 : vector<2x128xf32>
    %cst_12 = arith.constant 0.000000e+00 : f32
    %34 = vector.broadcast %cst_12 : f32 to vector<2x128xf32>
    %35 = arith.subf %34, %27 : vector<2x128xf32>
    %36 = arith.mulf %33, %35 : vector<2x128xf32>
    %c-100_i32 = arith.constant -100 : i32
    %37 = vector.broadcast %c-100_i32 : i32 to vector<2x128xi32>
    %38 = arith.cmpi ne, %3, %37 : vector<2x128xi32>
    %cst_13 = arith.constant 0.000000e+00 : f32
    %39 = vector.broadcast %cst_13 : f32 to vector<2x128xf32>
    %40 = arith.select %38, %36, %39 : vector<2x128xi1>, vector<2x128xf32>
    %cst_14 = arith.constant dense<0.000000e+00> : vector<128xf32>
    %41 = vector.multi_reduction <add>, %40, %cst_14 [0] : vector<2x128xf32> to vector<128xf32>
    %42 = vector.shape_cast %41 : vector<128xf32> to vector<1x128xf32>
    %c0_15 = arith.constant 0 : index
    %c0_16 = arith.constant 0 : index
    %c0_17 = arith.constant 0 : index
    %c0_18 = arith.constant 0 : index
    %43 = vector.load %arg4[%c0_15, %c0_16, %c0_17, %c0_18] : memref<1x1x1x128xf32, #tpu.memory_space<vmem>>, vector<1x1x1x128xf32>
    %44 = vector.shape_cast %43 : vector<1x1x1x128xf32> to vector<1x128xf32>
    %45 = vector.shape_cast %42 : vector<1x128xf32> to vector<1x1x1x128xf32>
    tpu.vector_store %arg4[%c0_15, %c0_16, %c0_17, %c0_18], %45 {strides = array<i32>} : memref<1x1x1x128xf32, #tpu.memory_space<vmem>>, vector<1x1x1x128xf32>,
    %46 = arith.extui %38 : vector<2x128xi1> to vector<2x128xi32>
    %47 = arith.sitofp %46 : vector<2x128xi32> to vector<2x128xf32>
    %cst_19 = arith.constant dense<0.000000e+00> : vector<128xf32>
    %48 = vector.multi_reduction <add>, %47, %cst_19 [0] : vector<2x128xf32> to vector<128xf32>
    %49 = vector.shape_cast %48 : vector<128xf32> to vector<1x128xf32>
    %c0_20 = arith.constant 0 : index
    %c0_21 = arith.constant 0 : index
    %c0_22 = arith.constant 0 : index
    %c0_23 = arith.constant 0 : index
    %50 = vector.load %arg5[%c0_20, %c0_21, %c0_22, %c0_23] : memref<1x1x1x128xf32, #tpu.memory_space<vmem>>, vector<1x1x1x128xf32>
    %51 = vector.shape_cast %50 : vector<1x1x1x128xf32> to vector<1x128xf32>
    %52 = vector.shape_cast %49 : vector<1x128xf32> to vector<1x1x1x128xf32>
    tpu.vector_store %arg5[%c0_20, %c0_21, %c0_22, %c0_23], %52 {strides = array<i32>} : memref<1x1x1x128xf32, #tpu.memory_space<vmem>>, vector<1x1x1x128xf32>,
    return
  }
  func.func @transform_0(%arg0: i32, %arg1: i32) -> (i32, i32, i32, i32) {
    %c0_i32 = arith.constant 0 : i32
    %c0_i32_0 = arith.constant 0 : i32
    %c0_i32_1 = arith.constant 0 : i32
    return %arg0, %c0_i32, %arg1, %c0_i32_0 : i32, i32, i32, i32
  }
  func.func @transform_1(%arg0: i32, %arg1: i32) -> (i32, i32, i32) {
    %c0_i32 = arith.constant 0 : i32
    %c0_i32_0 = arith.constant 0 : i32
    return %arg0, %arg1, %c0_i32 : i32, i32, i32
  }
  func.func @transform_2(%arg0: i32, %arg1: i32) -> (i32, i32, i32, i32) {
    %c0_i32 = arith.constant 0 : i32
    %c0_i32_0 = arith.constant 0 : i32
    %c0_i32_1 = arith.constant 0 : i32
    return %arg0, %arg1, %c0_i32, %c0_i32_0 : i32, i32, i32, i32
  }
  func.func @transform_3(%arg0: i32, %arg1: i32) -> (i32, i32, i32, i32) {
    %c0_i32 = arith.constant 0 : i32
    %c0_i32_0 = arith.constant 0 : i32
    %c0_i32_1 = arith.constant 0 : i32
    return %arg0, %arg1, %c0_i32, %c0_i32_0 : i32, i32, i32, i32
  }
}

</mosaic_0001>

<bundles_post_ra>
// kernel: tpu_custom_call.1
= control target key start
LH: loop header
LB: loop body
LE: loop exit
PB: predicated region body
PF: predicated region fallthrough
CT: control target
= control target key end

     0   :  { %s982_s0 = inlined_call_operand.hbm [shape: f32[2,2,2,128], index: 0, kind: input, shape index: {}]   ;;  %s983_s1 = inlined_call_operand.hbm [shape: s32[2,2,128], index: 1, kind: input, shape index: {}]   ;;  %s984_s2 = inlined_call_operand.hbm [shape: f32[2,1,1,128], index: 2, kind: output, shape index: {0}]   ;;  %s985_s3 = inlined_call_operand.hbm [shape: f32[2,1,1,128], index: 3, kind: output, shape index: {1}]  }
   0x1   :  { %986 = sst [smem:[#allocation14_spill]] %s982_s0 }
   0x2   :  { %9 = vsyncpa [#allocation3], 0 }
   0x3   :  { %11 = vsyncpa [#allocation3 + $0x1], 0 }
   0x4   :  { %12 = vsyncpa [#allocation6], 0 }
   0x5   :  { %14 = vsyncpa [#allocation6 + $0x1], 0 }
   0x6   :  { %15 = vsyncpa [#allocation4], 0 }
   0x7   :  { %17 = vsyncpa [#allocation4 + $0x1], 0 }
   0x8   :  { %18 = vsyncpa [#allocation9], 0 }
   0x9   :  { %20 = vsyncpa [#allocation9 + $0x1], 0  ;;  %s771_s12 = smov 0   ;;  %s773_s13 = smov 0  }
   0xa   :  { %s775_s14 = smov 0   ;;  %s777_s15 = smov 0  }
   0xb   :  { %s779_s16 = smov 0   ;;  %s781_s17 = smov 0  }
   0xc LB: > { %s471_s18 = sadd.s32 4294967295, %s742_s17   ;;  %s472_s19 = sadd.s32 4294967294, %s742_s17   ;;  %s742_s17 = sphi %s781_s17, %s26_s17   ;;  %s738_s16 = sphi %s779_s16, %s999_s16   ;;  %s734_s15 = sphi %s777_s15, %s998_s15   ;;  %s730_s14 = sphi %s775_s14, %s997_s14   ;;  %s726_s13 = sphi %s773_s13, %s996_s13   ;;  %s722_s12 = sphi %s771_s12, %s995_s12  }
   0xd   : > { %s38_s20 = sadd.s32 1, %s738_s16  ;;  %s47_s21 = sadd.s32 1, %s730_s14 }
   0xe   : > { %p40_p0 = scmp.ge.s32.totalorder %s38_s20, 2  ;;  %p54_p1 = scmp.ne.s32.totalorder %s730_s14, %s726_s13 }
   0xf   : > { %p55_p2 = scmp.eq.s32.totalorder %s742_s17, 0  ;;  %p60_p3 = scmp.ne.s32.totalorder %s726_s13, %s722_s12 }
  0x10   : > { %s1001_s20 = smov (%p40_p0, %s38_s20), 0  ;;  %p61_p5 = scmp.eq.s32.totalorder %s471_s18, 0 }
  0x11   : > { %p812_p4 = por %p55_p2, %p54_p1  ;;  %s42_s23 = ssub.s32 %s738_s16, %s1001_s20 }
  0x12   : > { %p114_p6 = scmp.eq.s32.totalorder %s471_s18, 1  ;;  %p45_p7 = scmp.eq.s32.totalorder %s42_s23, 0 }
  0x13   : > { %p818_p8 = por %p61_p5, %p60_p3  ;;  %p120_p10 = scmp.eq.s32.totalorder %s472_s19, 1 }
  0x14   : > { %p822_p9 = por %p114_p6, %p54_p1  ;;  %p511_p13 = scmp.lt.s32.totalorder %s742_s17, 2 }
  0x15   : > { %s827_s26 = scalar_select %p45_p7, %s730_s14, %s47_s21  }
  0x16   : > { %p829_p11 = por %p120_p10, %p60_p3  ;;  %s836_s28 = sand.u32 1, %s730_s14  }
  0x17   : > { %s475_s29 = sshll.u32 %s836_s28, 2  ;;  %s488_s30 = sshll.u32 %s738_s16, 6 }
  0x18   : > { %s991_s0 = sld [smem:[#allocation14_spill]]  ;;  %s172_s7 = scalar_lea.vmem [#allocation2], %s475_s29 }
  0x19   : > { %s180_s8 = sshll.u32 %s172_s7, 4  ;;  %p845_p0 = pnand %p511_p13, %p812_p4  ;;  %s181_s8 = int_to_ptr.vmem [resolvable:$true] %s180_s8 }
  0x1a   : > { %p480_p1 = scmp.ge.s32.totalorder %s742_s17, 1  ;;  %s169_s10 = scalar_lea.sflag [#allocation3], %s836_s28 }
  0x1b   : > { %p574_p2 = pneg %p845_p0  ;;  %s585_s11 = scalar_lea.vmem %s181_s8, 64 }
  0x1c   : > { %p586_p3 = scmp.ne.s32.totalorder %s181_s8, %s585_s11  ;;  %s744_s18 = smov [#allocation2]  }
  0x1d   : > { %s590_s19 = sshll.u32 %s744_s18, 4  ;;  %s591_s19 = int_to_ptr.vmem [resolvable:$false] %s590_s19 }
  0x1e   : > { %s179_s6 = scalar_lea.hbm %s991_s0, %s488_s30  ;;  %p588_p5 = pnand %p586_p3, %p574_p2 }
  0x1f   : > { %s592_s21 = scalar_lea.vmem %s591_s19, 128  ;;  %p593_p4 = scmp.lt.s32.totalorder %s181_s8, %s591_s19 }
  0x20   : > { %p589_p6 = pneg %p588_p5  ;;  %p594_p7 = scmp.lt.s32.totalorder %s592_s21, %s585_s11 }
  0x22   : > { %p595_p10 = por %p594_p7, %p593_p4 }
  0x24   : > { %p596_p13 = pnand %p595_p10, %p589_p6 }
  0x26   : > { %599 = shalt.err (!%p596_p13)
}
  0x27   : > { %s745_s22 = smov 32   ;;  %s746_s23 = smov 2  }
  0x28   : > { %500 = dma.hbm_to_vmem [thread:$0]  (!%p845_p0), %s179_s6, 64, %s181_s8, %s169_s10, %s745_s22, %s745_s22, %s746_s23  }
  0x29   : > { %p207_p3 = scmp.lt.s32.totalorder %s742_s17, 3  ;;  %s478_s29 = sshll.u32 %s836_s28, 1 }
  0x2a   : > { %s479_s30 = sshll.u32 %s738_s16, 5  ;;  %s194_s18 = scalar_lea.vmem [#allocation5], %s478_s29 }
  0x2b   : > { %p863_p5 = pnand %p480_p1, %p207_p3  ;;  %s200_s11 = scalar_lea.hbm %s983_s1, %s479_s30 }
  0x2c   : > { %s202_s19 = sshll.u32 %s194_s18, 4  ;;  %s191_s21 = scalar_lea.sflag [#allocation6], %s836_s28  ;;  %s203_s19 = int_to_ptr.vmem [resolvable:$true] %s202_s19 }
  0x2d   : > { %s613_s0 = scalar_lea.vmem %s203_s19, 32  ;;  %s747_s6 = smov [#allocation5]  }
  0x2e   : > { %p614_p6 = scmp.ne.s32.totalorder %s203_s19, %s613_s0  ;;  %s618_s8 = sshll.u32 %s747_s6, 4  ;;  %s619_s8 = int_to_ptr.vmem [resolvable:$false] %s618_s8 }
  0x2f   : > { %s620_s10 = scalar_lea.vmem %s619_s8, 64  ;;  %p621_p1 = scmp.lt.s32.totalorder %s203_s19, %s619_s8 }
  0x30   : > { %p616_p4 = pnand %p614_p6, %p574_p2  ;;  %p622_p10 = scmp.lt.s32.totalorder %s620_s10, %s613_s0 }
  0x32   : > { %p617_p7 = pneg %p616_p4  ;;  %p623_p13 = por %p622_p10, %p621_p1 }
  0x34   : > { %p624_p3 = pnand %p623_p13, %p617_p7 }
  0x36   : > { %627 = shalt.err (!%p624_p3)
}
  0x37   : > { %503 = dma.hbm_to_vmem [thread:$0]  (!%p845_p0), %s200_s11, 32, %s203_s19, %s191_s21  }
  0x38   : > { %211 = sbr.rel (%p863_p5) target bundleno = 168 (0xa8), region = 28  ;;  %s879_s28 = sand.u32 (!%p863_p5), 1, %s726_s13  }
  0x39   : > { %s481_s22 = sshll.u32 (!%p863_p5), %s879_s28, 2  ;;  %s214_s23 = scalar_lea.sflag (!%p863_p5), [#allocation3], %s879_s28 }
  0x3a   : > { %s217_s29 = scalar_lea.vmem (!%p863_p5), [#allocation2], %s481_s22 }
  0x3d   : > { %705 = dma.done.wait (%p818_p8), %s214_s23, 64  }
  0x3e   : > { %707 = vsyncadd (%p818_p8), %s214_s23, 4294967232  ;;  %s482_s0 = sshll.u32 %s879_s28, 1  ;;  %s223_s9 = scalar_lea.sflag [#allocation6], %s879_s28 }
  0x3f   : > { %s226_s30 = scalar_lea.vmem [#allocation5], %s482_s0 }
  0x40   : > { %709 = dma.done.wait (%p818_p8), %s223_s9, 32  }
  0x41   : > { %711 = vsyncadd (%p818_p8), %s223_s9, 4294967264  ;;  %vm260_vm0 = vcmask 1041408   ;;  %v257_v0 = vld [vmem:[%s217_s29] sm:$0x3]  ;;  %v258_v1 = vld [vmem:[%s217_s29 + $0x2] sm:$0x3] }
  0x42   : > { %v893_v2 = vld [vmem:[%s226_s30] sm:$0x3]  ;;  %v261_v3 = vsel %vm260_vm0, %v257_v0, -inf  ;;  %v262_v4 = vsel %vm260_vm0, %v258_v1, -inf  ;;  %v748_v6 = vmov 0.0   ;;  %s256_s24 = scalar_lea.vmem [#allocation8], %s879_s28 }
  0x43   : > { %v263_v5 = vmax.f32 %v261_v3, %v262_v4  ;;  %vm289_vm1 = vcmp.ne.s32.totalorder %v893_v2, 4294967196  ;;  %s341_s4 = sshll.u32 %s256_s24, 4  ;;  %s484_s5 = sshll.u32 %s734_s15, 4  ;;  %s903_s4 = int_to_ptr.vmem [resolvable:$true] %s341_s4 }
  0x44   : > { %v483_v7 = vsel %vm289_vm1, 1.0, %v748_v6  ;;  %s339_s18 = scalar_lea.hbm %s985_s3, %s484_s5  ;;  %s314_s19 = scalar_lea.sflag [#allocation9], %s879_s28 }
  0x45   : > { %v264_v8 = vsub.f32 %v257_v0, %v263_v5  ;;  %v265_v9 = vsub.f32 %v258_v1, %v263_v5  ;;  %v301_v10 = vsel %vm260_vm0, %v483_v7, 0.0  ;;  %s628_s21 = scalar_lea.vmem %s903_s4, 16  ;;  %s749_s6 = smov [#allocation8]  }
  0x46   : > { %v302_v11 = vrot.slane %v301_v10, 4  ;;  %p629_p8 = scmp.ne.s32.totalorder %s903_s4, %s628_s21  ;;  %s632_s8 = sshll.u32 %s749_s6, 4  ;;  %s633_s8 = int_to_ptr.vmem [resolvable:$false] %s632_s8 }
  0x47   : > { %v266_v12 = vmul.f32 1.442695, %v264_v8  ;;  %v268_v13 = vmul.f32 1.442695, %v265_v9  ;;  %s634_s10 = scalar_lea.vmem %s633_s8, 32  ;;  %p635_p5 = scmp.lt.s32.totalorder %s903_s4, %s633_s8 }
  0x48   : > { %v303_v14 = vadd.f32 %v302_v11, %v301_v10  ;;  %p630_p0 = pnand %p629_p8, %p822_p9  ;;  %p636_p6 = scmp.lt.s32.totalorder %s634_s10, %s628_s21 }
  0x49   : > { %564 = vpow2.f32 %v266_v12 }
  0x4a   : > { %566 = vpow2.f32 %v268_v13  ;;  %v304_v15 = vrot.slane %v303_v14, 2  ;;  %p631_p2 = pneg %p630_p0  ;;  %p637_p4 = por %p636_p6, %p635_p5 }
  0x4c   : > { %v305_v16 = vadd.f32 %v304_v15, %v303_v14  ;;  %p638_p7 = pnand %p637_p4, %p631_p2 }
  0x4e   : > { %v306_v17 = vrot.slane %v305_v16, 1 }
  0x50   : > { %v307_v18 = vadd.f32 %v306_v17, %v305_v16 }
  0x52   : > { %308 = vst [vmem:[%s256_s24] sm:$0x1] %v307_v18 }
  0x53   : > { %641 = shalt.err (!%p638_p7)
}
  0x54   : > { %s642_s22 = scalar_lea.hbm %s339_s18, 16  ;;  %s646_s0 = scalar_lea.hbm %s985_s3, 32 }
  0x55   : > { %p643_p1 = scmp.ne.s32.totalorder %s339_s18, %s642_s22  ;;  %p647_p3 = scmp.lt.s32.totalorder %s339_s18, %s985_s3 }
  0x56   : > { %p648_p8 = scmp.lt.s32.totalorder %s646_s0, %s642_s22 }
  0x57   : > { %p644_p10 = pnand %p643_p1, %p822_p9 }
  0x58   : > { %p649_p0 = por %p648_p8, %p647_p3 }
  0x59   : > { %p645_p13 = pneg %p644_p10 }
  0x5b   : > { %p650_p12 = pnand %p649_p0, %p645_p13 }
  0x5d   : > { %653 = shalt.err (!%p650_p12)
}
  0x5e   : > { %494 = dma.vmem_to_hbm [thread:$0]  (%p822_p9), %s903_s4, 16, %s339_s18, %s314_s19   ;;  %v565_v19 = vpop.eup %564  ;;  %vm276_vm2 = vcmp.eq.s32.totalorder %v893_v2, 0  ;;  %vm279_vm3 = vcmp.eq.s32.totalorder %v893_v2, 1 }
  0x5f   : > { %v567_v20 = vpop.eup %566  ;;  %v270_v21 = vsel %vm260_vm0, %v565_v19, 0.0  ;;  %v277_v24 = vsel %vm276_vm2, %v257_v0, 0.0  ;;  %v280_v25 = vsel %vm279_vm3, %v258_v1, 0.0  ;;  %s250_s24 = scalar_lea.vmem [#allocation7], %s879_s28  ;;  %s325_s18 = scalar_lea.hbm %s984_s2, %s484_s5 }
  0x60   : > { %v271_v22 = vsel %vm260_vm0, %v567_v20, 0.0  ;;  %v281_v28 = vadd.f32 %v280_v25, %v277_v24  ;;  %s327_s4 = sshll.u32 %s250_s24, 4  ;;  %s310_s19 = scalar_lea.sflag [#allocation4], %s879_s28  ;;  %s935_s4 = int_to_ptr.vmem [resolvable:$true] %s327_s4 }
  0x61   : > { %v272_v23 = vadd.f32 %v271_v22, %v270_v21  ;;  %s654_s21 = scalar_lea.vmem %s935_s4, 16  ;;  %s750_s6 = smov [#allocation7]  }
  0x62   : > { %p655_p12 = scmp.ne.s32.totalorder %s935_s4, %s654_s21  ;;  %s658_s8 = sshll.u32 %s750_s6, 4  ;;  %s659_s8 = int_to_ptr.vmem [resolvable:$false] %s658_s8 }
  0x63   : > { %568 = vlog2.f32 %v272_v23  ;;  %s660_s10 = scalar_lea.vmem %s659_s8, 32  ;;  %p661_p6 = scmp.lt.s32.totalorder %s935_s4, %s659_s8 }
  0x64   : > { %p656_p2 = pnand %p655_p12, %p822_p9  ;;  %p662_p4 = scmp.lt.s32.totalorder %s660_s10, %s654_s21 }
  0x66   : > { %p657_p5 = pneg %p656_p2  ;;  %p663_p7 = por %p662_p4, %p661_p6 }
  0x68   : > { %p664_p1 = pnand %p663_p7, %p657_p5 }
  0x70   : > { %v569_v26 = vpop.eup %568 }
  0x71   : > { %v274_v27 = vmul.f32 0.6931472, %v569_v26 }
  0x73   : > { %v275_v29 = vadd.f32 %v274_v27, %v263_v5 }
  0x75   : > { %v282_v30 = vsub.f32 %v281_v28, %v275_v29 }
  0x77   : > { %v283_v31 = vmul.f32 1.442695, %v282_v30  ;;  %v287_v34 = vsub.f32 0.0, %v282_v30 }
  0x79   : > { %570 = vpow2.f32 %v283_v31 }
  0x86   : > { %v571_v32 = vpop.eup %570 }
  0x87   : > { %v285_v33 = vsub.f32 1.0, %v571_v32 }
  0x89   : > { %v286_v35 = vmul.f32 %v285_v33, %v285_v33 }
  0x8b   : > { %v288_v36 = vmul.f32 %v287_v34, %v286_v35 }
  0x8d   : > { %v290_v37 = vsel %vm289_vm1, %v288_v36, 0.0 }
  0x8e   : > { %v291_v38 = vsel %vm260_vm0, %v290_v37, 0.0 }
  0x8f   : > { %v292_v39 = vrot.slane %v291_v38, 4 }
  0x91   : > { %v293_v40 = vadd.f32 %v292_v39, %v291_v38 }
  0x93   : > { %v294_v41 = vrot.slane %v293_v40, 2 }
  0x95   : > { %v295_v42 = vadd.f32 %v294_v41, %v293_v40 }
  0x97   : > { %v296_v43 = vrot.slane %v295_v42, 1 }
  0x99   : > { %v297_v44 = vadd.f32 %v296_v43, %v295_v42 }
  0x9b   : > { %298 = vst [vmem:[%s250_s24] sm:$0x1] %v297_v44 }
  0x9c   : > { %667 = shalt.err (!%p664_p1)
}
  0x9d   : > { %s668_s15 = scalar_lea.hbm %s325_s18, 16  ;;  %s672_s22 = scalar_lea.hbm %s984_s2, 32 }
  0x9e   : > { %p669_p10 = scmp.ne.s32.totalorder %s325_s18, %s668_s15  ;;  %p673_p8 = scmp.lt.s32.totalorder %s325_s18, %s984_s2 }
  0x9f   : > { %p674_p0 = scmp.lt.s32.totalorder %s672_s22, %s668_s15 }
  0xa0   : > { %p670_p13 = pnand %p669_p10, %p822_p9 }
  0xa1   : > { %p675_p12 = por %p674_p0, %p673_p8 }
  0xa2   : > { %p671_p3 = pneg %p670_p13 }
  0xa4   : > { %p676_p2 = pnand %p675_p12, %p671_p3 }
  0xa6   : > { %679 = shalt.err (!%p676_p2)
}
  0xa7   : > { %493 = dma.vmem_to_hbm [thread:$0]  (%p822_p9), %s935_s4, 16, %s325_s18, %s310_s19  }
  0xa8 PF: > { %s353_s0 = sand.u32 1, %s722_s12   ;;  %p994_p5 = scmp.ge.s32.totalorder %s742_s17, 2 }
  0xa9   : > { %s354_s9 = scalar_lea.sflag [#allocation4], %s353_s0 }
  0xaa   : > { %p505_p6 = pnand %p994_p5, %p829_p11 }
  0xac   : > { %p506_p4 = pneg %p505_p6 }
  0xae   : > { %713 = dma.done.wait (%p506_p4), %s354_s9, 16  }
  0xaf   : > { %715 = vsyncadd (%p506_p4), %s354_s9, 4294967280  ;;  %s362_s30 = scalar_lea.sflag [#allocation9], %s353_s0 }
  0xb0   : > { %717 = dma.done.wait (%p506_p4), %s362_s30, 16  }
  0xb1   : > { %719 = vsyncadd (%p506_p4), %s362_s30, 4294967280  ;;  %s26_s17 = sadd.s32 1, %s742_s17   ;;  %s995_s12 = smov %s726_s13 }
  0xb2   : > { %p23_p7 = scmp.ge.s32.totalorder %s26_s17, 4   ;;  %s996_s13 = smov %s730_s14 }
  0xb3   : > { %s997_s14 = smov %s827_s26  ;;  %s998_s15 = smov %s738_s16 }
  0xb4   : > { %s999_s16 = smov %s1001_s20  ;;  %25 = sbr.rel (!%p23_p7) target bundleno = 12 (0xc), region = 103 }
  0xb9   :  { %366 = vsyncpa [#allocation3], 1 }
  0xba   :  { %368 = vsyncpa [#allocation3 + $0x1], 1 }
  0xbb   :  { %369 = vsyncpa [#allocation6], 1 }
  0xbc   :  { %371 = vsyncpa [#allocation6 + $0x1], 1 }
  0xbd   :  { %372 = vsyncpa [#allocation4], 1 }
  0xbe   :  { %374 = vsyncpa [#allocation4 + $0x1], 1 }
  0xbf   :  { %375 = vsyncpa [#allocation9], 1 }
  0xc0   :  { %377 = vsyncpa [#allocation9 + $0x1], 1 }

</bundles_post_ra>
